<compile_context>
chip_gen: v7x
topology: tpu7x:2x2x1
jax: 0.10.0
libtpu: 0.0.40
codegen_flags: <defaults>
</compile_context>

<pallas_src>
import math
import jax
import jax.numpy as jnp
from jax.experimental import pallas as pl
from jax.experimental.pallas import tpu as pltpu

# ---------------- hyperparameters (small, consistent with the module) ----------------
B = 2            # batch
C_IN = 4         # args['common']['n_features']
L_IN = 16        # args['common']['seq_len']
C_OUT = 8        # args['crnn']['out_channel']
KERNEL = 3       # args['crnn']['kernel']
STRIDE = 2       # args['crnn']['stride']
POOL = 2         # args['crnn']['pool']
HID = 32         # args['crnn']['hidden_dim']
N_LAYERS = 1     # args['crnn']['n_layers']  -> dropout = 0
N_CLASSES = 3    # args['common']['n_classes']
EPS = 1e-5       # PyTorch BatchNorm1d default eps

L_CONV = (L_IN - KERNEL) // STRIDE + 1          # Conv1d output length  = 7
L_POOL = (L_CONV - POOL) // STRIDE + 1          # MaxPool1d output len  = 3
TRANSFORM_DIM = math.ceil(
    (math.ceil((L_IN - KERNEL - 2) / STRIDE) + 1 - POOL - 2) / STRIDE) + 1
assert TRANSFORM_DIM == L_POOL, "config must satisfy the module's transform_dim formula"

CK = C_IN * KERNEL          # im2col width (12)
OUT_W = 128                 # lane-dense packed output width (logits + last hidden)

# rows of the packed small-parameter array
_BCONV, _G1, _BE1, _BRNN, _G2, _BE2, _B1, _BOUT = range(8)


def crnn_kernel(xcol_ref, wconv_ref, wih_bd_ref, whh_ref, w1f_ref, wout_ref,
                vec_ref, out_ref):
    # ---------- Conv1d as a single im2col matmul (+bias, ReLU; Dropout(p=0) identity) ----------
    y = jnp.dot(xcol_ref[...], wconv_ref[...],
                preferred_element_type=jnp.float32)                     # (B*L_conv, C_out)
    y = jnp.maximum(y + vec_ref[_BCONV:_BCONV + 1, 0:C_OUT], 0.0)

    # ---------- BatchNorm1d(out_channel): training-mode batch stats (biased var) ----------
    mu1 = jnp.mean(y, axis=0, keepdims=True)
    var1 = jnp.mean((y - mu1) ** 2, axis=0, keepdims=True)
    y = ((y - mu1) * jax.lax.rsqrt(var1 + EPS) * vec_ref[_G1:_G1 + 1, 0:C_OUT]
         + vec_ref[_BE1:_BE1 + 1, 0:C_OUT])

    # ---------- MaxPool1d(pool, stride): per-window max, lane-concatenated (no stacks) ----------
    y3 = y.reshape(B, L_CONV, C_OUT)
    p_parts = [jnp.max(y3[:, t * STRIDE: t * STRIDE + POOL, :], axis=1)  # each (B, C_out)
               for t in range(L_POOL)]
    p_cat = jnp.concatenate(p_parts, axis=1)                             # (B, L_pool*C_out)

    # ---------- RNN input projection hoisted out of the recurrence: ONE matmul ----------
    # block-diagonal W_ih maps pooled slice t -> lanes [t*HID, (t+1)*HID); b_ih+b_hh pre-tiled.
    xh = (jnp.dot(p_cat, wih_bd_ref[...], preferred_element_type=jnp.float32)
          + vec_ref[_BRNN:_BRNN + 1, 0:L_POOL * HID])                    # (B, L_pool*HID)

    # ---------- single-layer unidirectional tanh-RNN (serial part: one matmul + tanh per step) ----
    whh = whh_ref[...]
    h = jnp.zeros((B, HID), jnp.float32)
    hs = []
    for t in range(L_POOL):
        h = jnp.tanh(xh[:, t * HID:(t + 1) * HID]
                     + jnp.dot(h, whh, preferred_element_type=jnp.float32))
        hs.append(h)

    # ---------- BatchNorm1d(hidden_dim) over (batch, time) without stacking ----------
    inv_n = 1.0 / float(B * L_POOL)
    mu2 = hs[0].sum(axis=0, keepdims=True)
    for t in range(1, L_POOL):
        mu2 = mu2 + hs[t].sum(axis=0, keepdims=True)
    mu2 = mu2 * inv_n
    var2 = ((hs[0] - mu2) ** 2).sum(axis=0, keepdims=True)
    for t in range(1, L_POOL):
        var2 = var2 + ((hs[t] - mu2) ** 2).sum(axis=0, keepdims=True)
    var2 = var2 * inv_n
    scale2 = jax.lax.rsqrt(var2 + EPS) * vec_ref[_G2:_G2 + 1, 0:HID]
    shift2 = vec_ref[_BE2:_BE2 + 1, 0:HID] - mu2 * scale2

    # flatten order (torch: permute(0,2,1).reshape(B,-1) => flat[b, h*L_pool + t]) is absorbed
    # into the w1f layout built in the wrapper; here z_cat is simply [t*HID + h].
    z_cat = jnp.concatenate([hs[t] * scale2 + shift2 for t in range(L_POOL)], axis=1)

    # ---------- fc1 fused into a single matmul (Dropout(p=0) identity) ----------
    f1 = (jnp.dot(z_cat, w1f_ref[...], preferred_element_type=jnp.float32)
          + vec_ref[_B1:_B1 + 1, 0:HID])                                  # (B, HID)

    # ---------- fc2 + last hidden packed into ONE lane-dense (B, 128) output ----------
    # wout: rows [0,HID) -> logits in lanes [0,N_CLASSES); rows [HID,2HID) -> identity into
    # lanes [HID, 2HID) carrying the final hidden state.
    fo = jnp.concatenate([f1, h], axis=1)                                 # (B, 2*HID)
    out_ref[...] = (jnp.dot(fo, wout_ref[...], preferred_element_type=jnp.float32)
                    + vec_ref[_BOUT:_BOUT + 1, :])


def _pad_row(v, width=OUT_W):
    v = jnp.asarray(v, jnp.float32).reshape(-1)
    return jnp.zeros((width,), jnp.float32).at[: v.shape[0]].set(v)


def crnn_forward(x_ncl, params):
    """x_ncl: (B, C_in, L_in) like the PyTorch module. Returns (logits, hidden)."""
    x = x_ncl.astype(jnp.float32)

    # im2col (layout plumbing only): xcol[b*L_conv + t, ci*K + k] = x[b, ci, t*stride + k]
    gather_idx = jnp.arange(L_CONV)[:, None] * STRIDE + jnp.arange(KERNEL)[None, :]
    xcol = jnp.transpose(x[:, :, gather_idx], (0, 2, 1, 3)).reshape(B * L_CONV, CK)

    # conv weight (C_out, C_in, K) -> (C_in*K, C_out) matching im2col column order
    wconv = params["conv_w"].reshape(C_OUT, CK).T.astype(jnp.float32)

    # block-diagonal input->hidden weight: kron(I_{L_pool}, W_ih^T)  -> (L_pool*C_out, L_pool*HID)
    wih_t = jnp.transpose(params["w_ih"]).astype(jnp.float32)             # (C_out, HID)
    wih_bd = jnp.kron(jnp.eye(L_POOL, dtype=jnp.float32), wih_t)

    whh = jnp.transpose(params["w_hh"]).astype(jnp.float32)               # (HID, HID)

    # fc1 weight (HID, HID*L_pool) with col = h*L_pool + t  ->  (L_pool*HID, HID) with row = t*HID + h
    w1f = jnp.transpose(params["fc1_w"].reshape(HID, HID, L_POOL),
                        (2, 1, 0)).reshape(L_POOL * HID, HID).astype(jnp.float32)

    # combined fc2 + hidden-passthrough output weight (lane-dense 128-wide output)
    wout = jnp.zeros((2 * HID, OUT_W), jnp.float32)
    wout = wout.at[:HID, :N_CLASSES].set(jnp.transpose(params["fc2_w"]).astype(jnp.float32))
    wout = wout.at[HID:, HID:2 * HID].set(jnp.eye(HID, dtype=jnp.float32))

    # all small vectors packed into one (8, 128) array -> single DMA
    vec = jnp.stack([
        _pad_row(params["conv_b"]),                                     # _BCONV
        _pad_row(params["bn1_g"]),                                      # _G1
        _pad_row(params["bn1_b"]),                                      # _BE1
        _pad_row(jnp.tile(params["b_ih"] + params["b_hh"], L_POOL)),    # _BRNN (folded + tiled)
        _pad_row(params["bn2_g"]),                                      # _G2
        _pad_row(params["bn2_b"]),                                      # _BE2
        _pad_row(params["fc1_b"]),                                      # _B1
        _pad_row(params["fc2_b"]),                                      # _BOUT
    ], axis=0)

    vmem = pl.BlockSpec(memory_space=pltpu.MemorySpace.VMEM)
    out = pl.pallas_call(
        crnn_kernel,
        out_shape=jax.ShapeDtypeStruct((B, OUT_W), jnp.float32),
        in_specs=[vmem] * 7,
        out_specs=vmem,
    )(xcol, wconv, wih_bd, whh, w1f, wout, vec)

    logits = out[:, :N_CLASSES]
    hidden = out[:, HID:2 * HID].reshape(N_LAYERS, B, HID)   # (num_layers*num_dirs, B, H)
    return logits, hidden


def init_params(key):
    ks = jax.random.split(key, 8)
    # TODO(synk): PyTorch's xavier_uniform_/orthogonal_ RNN init is not replicated bit-exactly;
    # deterministic scaled normals are used instead (biases zero, as in reset_parameters).
    # BatchNorm running-stat updates (a training side effect) are not modeled; normalization
    # uses batch statistics, matching a fresh .train() forward.
    return {
        "conv_w": jax.random.normal(ks[0], (C_OUT, C_IN, KERNEL), jnp.float32)
                  / math.sqrt(C_IN * KERNEL),
        "conv_b": 0.05 * jax.random.normal(ks[1], (C_OUT,), jnp.float32),
        "bn1_g": jnp.ones((C_OUT,), jnp.float32),
        "bn1_b": jnp.zeros((C_OUT,), jnp.float32),
        "w_ih": jax.random.normal(ks[2], (HID, C_OUT), jnp.float32)
                * math.sqrt(2.0 / (HID + C_OUT)),
        "w_hh": jax.random.normal(ks[3], (HID, HID), jnp.float32) / math.sqrt(HID),
        "b_ih": jnp.zeros((HID,), jnp.float32),
        "b_hh": jnp.zeros((HID,), jnp.float32),
        "bn2_g": jnp.ones((HID,), jnp.float32),
        "bn2_b": jnp.zeros((HID,), jnp.float32),
        "fc1_w": jax.random.normal(ks[4], (HID, HID * L_POOL), jnp.float32)
                 / math.sqrt(HID * L_POOL),
        "fc1_b": 0.05 * jax.random.normal(ks[5], (HID,), jnp.float32),
        "fc2_w": jax.random.normal(ks[6], (N_CLASSES, HID), jnp.float32) / math.sqrt(HID),
        "fc2_b": 0.05 * jax.random.normal(ks[7], (N_CLASSES,), jnp.float32),
    }


if __name__ == "__main__":
    key = jax.random.PRNGKey(0)
    k_x, k_p = jax.random.split(key)
    x = jax.random.normal(k_x, (B, C_IN, L_IN), jnp.float32)   # PyTorch NCL input
    params = init_params(k_p)

    logits, hidden = jax.jit(crnn_forward)(x, params)
    jax.block_until_ready((logits, hidden))

    assert logits.shape == (B, N_CLASSES)
    assert hidden.shape == (N_LAYERS, B, HID)
    assert bool(jnp.all(jnp.isfinite(logits))) and bool(jnp.all(jnp.isfinite(hidden)))
    print("KERNEL_OK")
</pallas_src>

<mosaic_0001>
module attributes {stable_mosaic.version = 11 : i64} {
  func.func @crnn_kernel(%arg0: memref<14x12xf32, #tpu.memory_space<vmem>>, %arg1: memref<12x8xf32, #tpu.memory_space<vmem>>, %arg2: memref<24x96xf32, #tpu.memory_space<vmem>>, %arg3: memref<32x32xf32, #tpu.memory_space<vmem>>, %arg4: memref<96x32xf32, #tpu.memory_space<vmem>>, %arg5: memref<64x128xf32, #tpu.memory_space<vmem>>, %arg6: memref<8x128xf32, #tpu.memory_space<vmem>>, %arg7: memref<2x128xf32, #tpu.memory_space<vmem>>) attributes {dimension_semantics = [], scalar_prefetch = 0 : i64, scratch_operands = 0 : i64, tpu.core_type = #tpu.core_type<tc>} {
    %c0 = arith.constant 0 : index
    %c0_0 = arith.constant 0 : index
    %0 = vector.load %arg0[%c0, %c0_0] : memref<14x12xf32, #tpu.memory_space<vmem>>, vector<14x12xf32>
    %c0_1 = arith.constant 0 : index
    %c0_2 = arith.constant 0 : index
    %1 = vector.load %arg1[%c0_1, %c0_2] : memref<12x8xf32, #tpu.memory_space<vmem>>, vector<12x8xf32>
    %cst = arith.constant dense<0.000000e+00> : vector<14x8xf32>
    %2 = tpu.matmul %0, %1, %cst {dimension_numbers = #tpu.dot_dimension_numbers<[1], [0], [0], [1], [0, 0, 1, 1], [], []>} : vector<14x12xf32>, vector<12x8xf32>, vector<14x8xf32> -> vector<14x8xf32>
    %c0_3 = arith.constant 0 : index
    %c0_4 = arith.constant 0 : index
    %3 = vector.load %arg6[%c0_3, %c0_4] : memref<8x128xf32, #tpu.memory_space<vmem>>, vector<1x8xf32>
    %4 = vector.broadcast %3 : vector<1x8xf32> to vector<14x8xf32>
    %5 = arith.addf %2, %4 : vector<14x8xf32>
    %cst_5 = arith.constant 0.000000e+00 : f32
    %6 = vector.broadcast %cst_5 : f32 to vector<14x8xf32>
    %7 = arith.maximumf %5, %6 : vector<14x8xf32>
    %cst_6 = arith.constant dense<0.000000e+00> : vector<8xf32>
    %8 = vector.multi_reduction <add>, %7, %cst_6 [0] : vector<14x8xf32> to vector<8xf32>
    %9 = vector.shape_cast %8 : vector<8xf32> to vector<1x8xf32>
    %cst_7 = arith.constant 1.400000e+01 : f32
    %10 = vector.broadcast %cst_7 : f32 to vector<1x8xf32>
    %11 = arith.divf %9, %10 : vector<1x8xf32>
    %12 = vector.broadcast %11 : vector<1x8xf32> to vector<14x8xf32>
    %13 = arith.subf %7, %12 : vector<14x8xf32>
    %14 = arith.mulf %13, %13 : vector<14x8xf32>
    %cst_8 = arith.constant dense<0.000000e+00> : vector<8xf32>
    %15 = vector.multi_reduction <add>, %14, %cst_8 [0] : vector<14x8xf32> to vector<8xf32>
    %16 = vector.shape_cast %15 : vector<8xf32> to vector<1x8xf32>
    %cst_9 = arith.constant 1.400000e+01 : f32
    %17 = vector.broadcast %cst_9 : f32 to vector<1x8xf32>
    %18 = arith.divf %16, %17 : vector<1x8xf32>
    %19 = vector.broadcast %11 : vector<1x8xf32> to vector<14x8xf32>
    %20 = arith.subf %7, %19 : vector<14x8xf32>
    %cst_10 = arith.constant 9.99999974E-6 : f32
    %21 = vector.broadcast %cst_10 : f32 to vector<1x8xf32>
    %22 = arith.addf %18, %21 : vector<1x8xf32>
    %23 = math.rsqrt %22 : vector<1x8xf32>
    %24 = vector.broadcast %23 : vector<1x8xf32> to vector<14x8xf32>
    %25 = arith.mulf %20, %24 : vector<14x8xf32>
    %c1 = arith.constant 1 : index
    %c0_11 = arith.constant 0 : index
    %26 = vector.load %arg6[%c1, %c0_11] : memref<8x128xf32, #tpu.memory_space<vmem>>, vector<1x8xf32>
    %27 = vector.broadcast %26 : vector<1x8xf32> to vector<14x8xf32>
    %28 = arith.mulf %25, %27 : vector<14x8xf32>
    %c2 = arith.constant 2 : index
    %c0_12 = arith.constant 0 : index
    %29 = vector.load %arg6[%c2, %c0_12] : memref<8x128xf32, #tpu.memory_space<vmem>>, vector<1x8xf32>
    %30 = vector.broadcast %29 : vector<1x8xf32> to vector<14x8xf32>
    %31 = arith.addf %28, %30 : vector<14x8xf32>
    %32 = vector.shape_cast %31 : vector<14x8xf32> to vector<2x7x8xf32>
    %33 = vector.extract_strided_slice %32 {offsets = [0, 0, 0], sizes = [2, 2, 8], strides = [1, 1, 1]} : vector<2x7x8xf32> to vector<2x2x8xf32>
    %cst_13 = arith.constant dense<0xFF800000> : vector<2x8xf32>
    %34 = vector.multi_reduction <maximumf>, %33, %cst_13 [1] : vector<2x2x8xf32> to vector<2x8xf32>
    %35 = vector.extract_strided_slice %32 {offsets = [0, 2, 0], sizes = [2, 2, 8], strides = [1, 1, 1]} : vector<2x7x8xf32> to vector<2x2x8xf32>
    %cst_14 = arith.constant dense<0xFF800000> : vector<2x8xf32>
    %36 = vector.multi_reduction <maximumf>, %35, %cst_14 [1] : vector<2x2x8xf32> to vector<2x8xf32>
    %37 = vector.extract_strided_slice %32 {offsets = [0, 4, 0], sizes = [2, 2, 8], strides = [1, 1, 1]} : vector<2x7x8xf32> to vector<2x2x8xf32>
    %cst_15 = arith.constant dense<0xFF800000> : vector<2x8xf32>
    %38 = vector.multi_reduction <maximumf>, %37, %cst_15 [1] : vector<2x2x8xf32> to vector<2x8xf32>
    %39 = tpu.concatenate %34, %36, %38 in 1 : vector<2x8xf32>, vector<2x8xf32>, vector<2x8xf32> -> vector<2x24xf32>
    %c0_16 = arith.constant 0 : index
    %c0_17 = arith.constant 0 : index
    %40 = vector.load %arg2[%c0_16, %c0_17] : memref<24x96xf32, #tpu.memory_space<vmem>>, vector<24x96xf32>
    %cst_18 = arith.constant dense<0.000000e+00> : vector<2x96xf32>
    %41 = tpu.matmul %39, %40, %cst_18 {dimension_numbers = #tpu.dot_dimension_numbers<[1], [0], [0], [1], [0, 0, 1, 1], [], []>} : vector<2x24xf32>, vector<24x96xf32>, vector<2x96xf32> -> vector<2x96xf32>
    %c3 = arith.constant 3 : index
    %c0_19 = arith.constant 0 : index
    %42 = vector.load %arg6[%c3, %c0_19] : memref<8x128xf32, #tpu.memory_space<vmem>>, vector<1x96xf32>
    %43 = vector.broadcast %42 : vector<1x96xf32> to vector<2x96xf32>
    %44 = arith.addf %41, %43 : vector<2x96xf32>
    %c0_20 = arith.constant 0 : index
    %c0_21 = arith.constant 0 : index
    %45 = vector.load %arg3[%c0_20, %c0_21] : memref<32x32xf32, #tpu.memory_space<vmem>>, vector<32x32xf32>
    %cst_22 = arith.constant 0.000000e+00 : f32
    %46 = vector.broadcast %cst_22 : f32 to vector<2x32xf32>
    %47 = vector.extract_strided_slice %44 {offsets = [0, 0], sizes = [2, 32], strides = [1, 1]} : vector<2x96xf32> to vector<2x32xf32>
    %cst_23 = arith.constant dense<0.000000e+00> : vector<2x32xf32>
    %48 = tpu.matmul %46, %45, %cst_23 {dimension_numbers = #tpu.dot_dimension_numbers<[1], [0], [0], [1], [0, 0, 1, 1], [], []>} : vector<2x32xf32>, vector<32x32xf32>, vector<2x32xf32> -> vector<2x32xf32>
    %49 = arith.addf %47, %48 : vector<2x32xf32>
    %50 = math.tanh %49 : vector<2x32xf32>
    %51 = vector.extract_strided_slice %44 {offsets = [0, 32], sizes = [2, 32], strides = [1, 1]} : vector<2x96xf32> to vector<2x32xf32>
    %cst_24 = arith.constant dense<0.000000e+00> : vector<2x32xf32>
    %52 = tpu.matmul %50, %45, %cst_24 {dimension_numbers = #tpu.dot_dimension_numbers<[1], [0], [0], [1], [0, 0, 1, 1], [], []>} : vector<2x32xf32>, vector<32x32xf32>, vector<2x32xf32> -> vector<2x32xf32>
    %53 = arith.addf %51, %52 : vector<2x32xf32>
    %54 = math.tanh %53 : vector<2x32xf32>
    %55 = vector.extract_strided_slice %44 {offsets = [0, 64], sizes = [2, 32], strides = [1, 1]} : vector<2x96xf32> to vector<2x32xf32>
    %cst_25 = arith.constant dense<0.000000e+00> : vector<2x32xf32>
    %56 = tpu.matmul %54, %45, %cst_25 {dimension_numbers = #tpu.dot_dimension_numbers<[1], [0], [0], [1], [0, 0, 1, 1], [], []>} : vector<2x32xf32>, vector<32x32xf32>, vector<2x32xf32> -> vector<2x32xf32>
    %57 = arith.addf %55, %56 : vector<2x32xf32>
    %58 = math.tanh %57 : vector<2x32xf32>
    %cst_26 = arith.constant dense<0.000000e+00> : vector<32xf32>
    %59 = vector.multi_reduction <add>, %50, %cst_26 [0] : vector<2x32xf32> to vector<32xf32>
    %60 = vector.shape_cast %59 : vector<32xf32> to vector<1x32xf32>
    %cst_27 = arith.constant dense<0.000000e+00> : vector<32xf32>
    %61 = vector.multi_reduction <add>, %54, %cst_27 [0] : vector<2x32xf32> to vector<32xf32>
    %62 = vector.shape_cast %61 : vector<32xf32> to vector<1x32xf32>
    %63 = arith.addf %60, %62 : vector<1x32xf32>
    %cst_28 = arith.constant dense<0.000000e+00> : vector<32xf32>
    %64 = vector.multi_reduction <add>, %58, %cst_28 [0] : vector<2x32xf32> to vector<32xf32>
    %65 = vector.shape_cast %64 : vector<32xf32> to vector<1x32xf32>
    %66 = arith.addf %63, %65 : vector<1x32xf32>
    %cst_29 = arith.constant 0.166666672 : f32
    %67 = vector.broadcast %cst_29 : f32 to vector<1x32xf32>
    %68 = arith.mulf %66, %67 : vector<1x32xf32>
    %69 = vector.broadcast %68 : vector<1x32xf32> to vector<2x32xf32>
    %70 = arith.subf %50, %69 : vector<2x32xf32>
    %71 = arith.mulf %70, %70 : vector<2x32xf32>
    %cst_30 = arith.constant dense<0.000000e+00> : vector<32xf32>
    %72 = vector.multi_reduction <add>, %71, %cst_30 [0] : vector<2x32xf32> to vector<32xf32>
    %73 = vector.shape_cast %72 : vector<32xf32> to vector<1x32xf32>
    %74 = vector.broadcast %68 : vector<1x32xf32> to vector<2x32xf32>
    %75 = arith.subf %54, %74 : vector<2x32xf32>
    %76 = arith.mulf %75, %75 : vector<2x32xf32>
    %cst_31 = arith.constant dense<0.000000e+00> : vector<32xf32>
    %77 = vector.multi_reduction <add>, %76, %cst_31 [0] : vector<2x32xf32> to vector<32xf32>
    %78 = vector.shape_cast %77 : vector<32xf32> to vector<1x32xf32>
    %79 = arith.addf %73, %78 : vector<1x32xf32>
    %80 = vector.broadcast %68 : vector<1x32xf32> to vector<2x32xf32>
    %81 = arith.subf %58, %80 : vector<2x32xf32>
    %82 = arith.mulf %81, %81 : vector<2x32xf32>
    %cst_32 = arith.constant dense<0.000000e+00> : vector<32xf32>
    %83 = vector.multi_reduction <add>, %82, %cst_32 [0] : vector<2x32xf32> to vector<32xf32>
    %84 = vector.shape_cast %83 : vector<32xf32> to vector<1x32xf32>
    %85 = arith.addf %79, %84 : vector<1x32xf32>
    %cst_33 = arith.constant 0.166666672 : f32
    %86 = vector.broadcast %cst_33 : f32 to vector<1x32xf32>
    %87 = arith.mulf %85, %86 : vector<1x32xf32>
    %cst_34 = arith.constant 9.99999974E-6 : f32
    %88 = vector.broadcast %cst_34 : f32 to vector<1x32xf32>
    %89 = arith.addf %87, %88 : vector<1x32xf32>
    %90 = math.rsqrt %89 : vector<1x32xf32>
    %c4 = arith.constant 4 : index
    %c0_35 = arith.constant 0 : index
    %91 = vector.load %arg6[%c4, %c0_35] : memref<8x128xf32, #tpu.memory_space<vmem>>, vector<1x32xf32>
    %92 = arith.mulf %90, %91 : vector<1x32xf32>
    %c5 = arith.constant 5 : index
    %c0_36 = arith.constant 0 : index
    %93 = vector.load %arg6[%c5, %c0_36] : memref<8x128xf32, #tpu.memory_space<vmem>>, vector<1x32xf32>
    %94 = arith.mulf %68, %92 : vector<1x32xf32>
    %95 = arith.subf %93, %94 : vector<1x32xf32>
    %96 = vector.broadcast %92 : vector<1x32xf32> to vector<2x32xf32>
    %97 = arith.mulf %50, %96 : vector<2x32xf32>
    %98 = vector.broadcast %95 : vector<1x32xf32> to vector<2x32xf32>
    %99 = arith.addf %97, %98 : vector<2x32xf32>
    %100 = vector.broadcast %92 : vector<1x32xf32> to vector<2x32xf32>
    %101 = arith.mulf %54, %100 : vector<2x32xf32>
    %102 = vector.broadcast %95 : vector<1x32xf32> to vector<2x32xf32>
    %103 = arith.addf %101, %102 : vector<2x32xf32>
    %104 = vector.broadcast %92 : vector<1x32xf32> to vector<2x32xf32>
    %105 = arith.mulf %58, %104 : vector<2x32xf32>
    %106 = vector.broadcast %95 : vector<1x32xf32> to vector<2x32xf32>
    %107 = arith.addf %105, %106 : vector<2x32xf32>
    %108 = tpu.concatenate %99, %103, %107 in 1 : vector<2x32xf32>, vector<2x32xf32>, vector<2x32xf32> -> vector<2x96xf32>
    %c0_37 = arith.constant 0 : index
    %c0_38 = arith.constant 0 : index
    %109 = vector.load %arg4[%c0_37, %c0_38] : memref<96x32xf32, #tpu.memory_space<vmem>>, vector<96x32xf32>
    %cst_39 = arith.constant dense<0.000000e+00> : vector<2x32xf32>
    %110 = tpu.matmul %108, %109, %cst_39 {dimension_numbers = #tpu.dot_dimension_numbers<[1], [0], [0], [1], [0, 0, 1, 1], [], []>} : vector<2x96xf32>, vector<96x32xf32>, vector<2x32xf32> -> vector<2x32xf32>
    %c6 = arith.constant 6 : index
    %c0_40 = arith.constant 0 : index
    %111 = vector.load %arg6[%c6, %c0_40] : memref<8x128xf32, #tpu.memory_space<vmem>>, vector<1x32xf32>
    %112 = vector.broadcast %111 : vector<1x32xf32> to vector<2x32xf32>
    %113 = arith.addf %110, %112 : vector<2x32xf32>
    %114 = tpu.concatenate %113, %58 in 1 : vector<2x32xf32>, vector<2x32xf32> -> vector<2x64xf32>
    %c0_41 = arith.constant 0 : index
    %c0_42 = arith.constant 0 : index
    %115 = vector.load %arg5[%c0_41, %c0_42] : memref<64x128xf32, #tpu.memory_space<vmem>>, vector<64x128xf32>
    %cst_43 = arith.constant dense<0.000000e+00> : vector<2x128xf32>
    %116 = tpu.matmul %114, %115, %cst_43 {dimension_numbers = #tpu.dot_dimension_numbers<[1], [0], [0], [1], [0, 0, 1, 1], [], []>} : vector<2x64xf32>, vector<64x128xf32>, vector<2x128xf32> -> vector<2x128xf32>
    %c7 = arith.constant 7 : index
    %c0_44 = arith.constant 0 : index
    %117 = vector.load %arg6[%c7, %c0_44] : memref<8x128xf32, #tpu.memory_space<vmem>>, vector<1x128xf32>
    %118 = vector.broadcast %117 : vector<1x128xf32> to vector<2x128xf32>
    %119 = arith.addf %116, %118 : vector<2x128xf32>
    %c0_45 = arith.constant 0 : index
    %c0_46 = arith.constant 0 : index
    %120 = vector.load %arg7[%c0_45, %c0_46] : memref<2x128xf32, #tpu.memory_space<vmem>>, vector<2x128xf32>
    tpu.vector_store %arg7[%c0_45, %c0_46], %119 {strides = array<i32>} : memref<2x128xf32, #tpu.memory_space<vmem>>, vector<2x128xf32>,
    return
  }
}

</mosaic_0001>

<bundles_post_ra>
// kernel: tile.8
= control target key start
LH: loop header
LB: loop body
LE: loop exit
PB: predicated region body
PF: predicated region fallthrough
CT: control target
= control target key end

     0   :  { %s22_s0 = inlined_call_operand.vmem [shape: f32[32], index: 0, kind: input, shape index: {}]   ;;  %s23_s1 = inlined_call_operand.vmem [shape: f32[3,32], index: 1, kind: output, shape index: {}]  }
   0x1   :  { %v4_v0 = vld [vmem:[%s22_s0] ss:$0 sm:$0xff] }
   0x2   :  { %5 = vst [vmem:[%s23_s1] sm:$0xf] %v4_v0 }

// kernel: crnn_forward.1
= control target key start
LH: loop header
LB: loop body
LE: loop exit
PB: predicated region body
PF: predicated region fallthrough
CT: control target
= control target key end

     0   :  { %vm42_vm0 = vcmask 1043456   ;;  %vm35_vm1 = vcmask 97280   ;;  %vm1279_vm2 = vmmov 1   ;;  %v1280_v5 = vmov 0.0|0.0   ;;  %s1286_s29 = smov 32   ;;  %s1287_s30 = smov 96   ;;  %s1554_s1 = inlined_call_operand.vmem [shape: f32[12,8], index: 1, kind: input, shape index: {}]   ;;  %s1555_s0 = inlined_call_operand.vmem [shape: f32[14,12], index: 0, kind: input, shape index: {}]   ;;  %s1556_s3 = inlined_call_operand.vmem [shape: f32[32,32], index: 3, kind: input, shape index: {}]   ;;  %s1557_s6 = inlined_call_operand.vmem [shape: f32[8,128], index: 6, kind: input, shape index: {}]   ;;  %s1558_s2 = inlined_call_operand.vmem [shape: f32[24,96], index: 2, kind: input, shape index: {}]   ;;  %s1559_s4 = inlined_call_operand.vmem [shape: f32[96,32], index: 4, kind: input, shape index: {}]   ;;  %s1560_s5 = inlined_call_operand.vmem [shape: f32[64,128], index: 5, kind: input, shape index: {}]   ;;  %s1561_s7 = inlined_call_operand.vmem [shape: f32[2,128], index: 7, kind: output, shape index: {}]  }
   0x1   :  { %v28_v0 = vld [vmem:[%s1554_s1] sm:$0xff]  ;;  %v29_v1 = vld [vmem:[%s1554_s1 + $0x8] sm:$0xf]  ;;  %vm1203_vm3 = vmpackc.low %vm42_vm0, %vm1279_vm2  ;;  %1208 = vmatprep.subr.bf16.mxu1 %v1280_v5  ;;  %vm125_vm4 = vcmask 62464   ;;  %vm123_vm5 = vcmask 64512   ;;  %v174_v43 = vlaneseq  ;;  %vm289_vm6 = vcmask 58368  }
   0x2   :  { %v1202_v2 = vpack.c.bf16 %v29_v1, %v28_v0  ;;  %v26_v3 = vld [vmem:[%s1555_s0] sm:$0xff]  ;;  %v27_v4 = vld [vmem:[%s1555_s0 + $0x8] sm:$0x3f]  ;;  %v1281_v41 = vmov 1966171168   ;;  %vm1283_vm7 = vmmov 0  }
   0x3   :  { %1111 = vmatprep.mubr.msk.f32.mxu0 %vm35_vm1, %v26_v3  ;;  %v498_v6 = vld [vmem:[%s1556_s3] sm:$0xff]  ;;  %v499_v7 = vld [vmem:[%s1556_s3 + $0x8] sm:$0xff]  ;;  %v172_v42 = vunpack.c.l.s4 %v1281_v41  ;;  %v1360_v45 = vshrl.u32 %v174_v43, 7  ;;  %vm398_vm8 = vcmask 1041409   ;;  %vm414_vm9 = vcmask 130048   ;;  %s1288_s8 = smov 64  }
   0x4   :  { %1204 = vmatprep.subr.msk.bf16.mxu0 %vm1203_vm3, %v1202_v2  ;;  %v1349_v8 = vpack.c.bf16 %v499_v7, %v498_v6  ;;  %v1047_v9 = vld [vmem:[%s1557_s6] ss:$0 sm:$0xff]  ;;  %v1051_v47 = vld [vmem:[%s1557_s6 + $0x1] ss:$0 sm:$0xff]  ;;  %v1052_v50 = vld [vmem:[%s1557_s6 + $0x2] ss:$0 sm:$0xff] }
   0x5   :  { %1207 = vmatpush3.bf16.msk.msra.mxu0 %vm1203_vm3, %v1202_v2  ;;  %v173_v44 = vunpack.c.0.s8 %v172_v42  ;;  %vm424_vm10 = vcmask 195584   ;;  %vm502_vm11 = vcmask 261120   ;;  %vm746_vm12 = vcmask 517376  }
   0x6   :  { %1211 = vmatprep.subr.bf16.mxu0 %v1280_v5  ;;  %vm759_vm13 = vcmask 779776   ;;  %vm738_vm14 = vcmask 254976   ;;  %vm858_vm15 = vcmask 523264   ;;  %vm877_vm0 = vcmask 785408  }
   0x7   :  { %v176_v53 = vsub.s32 %v173_v44, %v1360_v45 }
   0x8   :  { %1112 = vmatmul.mubr.msk.f32.vlgmr.msra.gmra.mrb[0].mxu0 %vm35_vm1, %v27_v4 }
   0x9   :  { %1213 = vmatpush3.bf16.msra.mxu0 %v1349_v8 }
   0xa   :  { %1214 = vmatprep.subr.bf16.mxu0 %v1280_v5 }
  0xdb   :  { %v1113_v10 = vpop.f32.mrb[0].mxu0 }
  0xdc   :  { %v118_v11 = vadd.f32 %v1113_v10, %v1047_v9  ;;  %v112_v12 = vpop.f32.mrb[1].mxu0 }
  0xdd   :  { %v113_v13 = vadd.f32 %v1047_v9, %v112_v12 }
  0xde   :  { %v122_v14 = vmax.f32 %v118_v11, 0.0 }
  0xdf   :  { %v121_v15 = vmax.f32 %v113_v13, 0.0 }
  0xe0   :  { %v126_v16 = vsel %vm125_vm4, %v122_v14, 0.0 }
  0xe1   :  { %v124_v17 = vsel %vm123_vm5, %v121_v15, 0.0 }
  0xe2   :  { %v127_v18 = vadd.f32 %v126_v16, %v124_v17 }
  0xe4   :  { %v128_v19 = vrot.slane %v127_v18, 4 }
  0xe6   :  { %v129_v20 = vadd.f32 %v128_v19, %v127_v18 }
  0xe8   :  { %v130_v21 = vrot.slane %v129_v20, 2 }
  0xea   :  { %v131_v22 = vadd.f32 %v130_v21, %v129_v20 }
  0xec   :  { %v132_v23 = vrot.slane %v131_v22, 1 }
  0xee   :  { %v133_v24 = vadd.f32 %v132_v23, %v131_v22 }
  0xf0   :  { %v135_v25 = vmul.f32 0.071428575, %v133_v24 }
  0xf2   :  { %v136_v26 = vsub.f32 %v121_v15, %v135_v25  ;;  %v137_v27 = vsub.f32 %v122_v14, %v135_v25 }
  0xf4   :  { %v138_v28 = vmul.f32 %v136_v26, %v136_v26  ;;  %v139_v29 = vmul.f32 %v137_v27, %v137_v27 }
  0xf6   :  { %v140_v30 = vsel %vm123_vm5, %v138_v28, 0.0  ;;  %v141_v31 = vsel %vm125_vm4, %v139_v29, 0.0  ;;  %v417_v28 = vld [vmem:[%s1558_s2 + $0x8] sm:$0xff] }
  0xf7   :  { %v142_v32 = vadd.f32 %v141_v31, %v140_v30 }
  0xf9   :  { %v143_v33 = vrot.slane %v142_v32, 4 }
  0xfb   :  { %v144_v34 = vadd.f32 %v143_v33, %v142_v32 }
  0xfd   :  { %v145_v35 = vrot.slane %v144_v34, 2 }
  0xff   :  { %v146_v36 = vadd.f32 %v145_v35, %v144_v34 }
 0x101   :  { %v147_v37 = vrot.slane %v146_v36, 1 }
 0x103   :  { %v148_v38 = vadd.f32 %v147_v37, %v146_v36 }
 0x105   :  { %v149_v39 = vmul.f32 0.071428575, %v148_v38 }
 0x107   :  { %v150_v40 = vadd.f32 1e-05, %v149_v39 }
 0x109   :  { %1269 = vrsqrt.f32 %v150_v40 }
 0x113   :  { %v1270_v46 = vpop.eup %1269 }
 0x114   :  { %v152_v48 = vmul.f32 %v1270_v46, %v136_v26  ;;  %v153_v49 = vmul.f32 %v1270_v46, %v137_v27  ;;  %v416_v27 = vld [vmem:[%s1558_s2] sm:$0xff]  ;;  %v500_v46 = vld [vmem:[%s1556_s3 + $0x10] sm:$0xff] }
 0x115   :  { %v1209_v40 = vpack.c.bf16 %v417_v28, %v416_v27 }
 0x116   :  { %v159_v51 = vmul.f32 %v1051_v47, %v152_v48  ;;  %v160_v52 = vmul.f32 %v1051_v47, %v153_v49  ;;  %v501_v47 = vld [vmem:[%s1556_s3 + $0x18] sm:$0xff]  ;;  %s1285_s3 = smov 16  }
 0x117   :  { %1210 = vmatpush3.bf16.msra.mxu1 %v1209_v40 }
 0x118   :  { %v166_v54 = vadd.f32 %v1052_v50, %v159_v51  ;;  %v167_v55 = vadd.f32 %v1052_v50, %v160_v52 }
 0x11a   :  { %v170_v56 = vcombine.high %v166_v54, %v166_v54  ;;  %v177_v57 = vrot.slane %v166_v54, %v176_v53  ;;  %v218_v58 = vcombine.high %v167_v55, %v167_v55  ;;  %v225_v59 = vrot.slane %v167_v55, %v176_v53 }
 0x11b   :  { %v1282_v55 = vmov 0.0  }
 0x11c   :  { %v184_v60 = vrot.slane %v170_v56, %v176_v53  ;;  %v185_v61 = vcombine.high %v177_v57, %v177_v57  ;;  %v232_v62 = vrot.slane %v218_v58, %v176_v53  ;;  %v233_v63 = vcombine.high %v225_v59, %v225_v59  ;;  %1118 = vmatprep.subr.mxu1 %v1282_v55  ;;  %v418_v56 = vld [vmem:[%s1558_s2 + $0x10] sm:$0xff]  ;;  %s1284_s2 = smov 8  }
 0x11d   :  { %v240_v0 = vrot.slane %v225_v59, %v176_v53  ;;  %v193_v2 = vrot.slane %v177_v57, %v176_v53  ;;  %v1215_v59 = vpack.c.bf16 %v501_v47, %v500_v46  ;;  %1119 = vmatpush3.msra.mxu1 %v418_v56  ;;  %1120 = vmatprep.mubr.msk.f32.mxu1 %vm1283_vm7, %v1282_v55 }
 0x11e   :  { %v186_v1 = vcombine.high %v184_v60, %v184_v60  ;;  %v207_v3 = vrot.slane %v185_v61, %v176_v53  ;;  %v254_v4 = vrot.slane %v233_v63, %v176_v53  ;;  %v200_v7 = vrot.slane %v184_v60, %v176_v53  ;;  %1131 = vmatprep.mubr.msk.f32.mxu0 %vm1283_vm7, %v1282_v55 }
 0x11f   :  { %v255_v6 = vcombine.high %v240_v0, %v240_v0  ;;  %v247_v12 = vrot.slane %v232_v62, %v176_v53  ;;  %1216 = vmatpush3.bf16.msra.mxu0 %v1215_v59  ;;  %1217 = vmatprep.subr.bf16.mxu1 %v1280_v5 }
 0x120   :  { %v214_v9 = vrot.slane %v186_v1, %v176_v53  ;;  %v257_v10 = vcombine.low %v193_v2, %v207_v3  ;;  %v1053_v11 = vcombine.high %v193_v2, %v207_v3  ;;  %v256_v13 = vcombine.high %v254_v4, %v254_v4  ;;  %1223 = vmatprep.subr.bf16.mxu0 %v1280_v5 }
 0x121   :  { %v319_v14 = vcombine.low %v254_v4, %v255_v6 }
 0x122   :  { %v217_v15 = vcombine.high %v214_v9, %v214_v9  ;;  %v264_v16 = vrot.slane %v257_v10, %v176_v53  ;;  %v350_v17 = vcombine.low %v200_v7, %v214_v9  ;;  %v311_v18 = vrot.slane %v1053_v11, %v176_v53  ;;  %1132 = vmatmul.mubr.f32.vlgmr.msra.gmra.mrb[2].mxu0 %v1282_v55 }
 0x123   :  { %v326_v19 = vrot.slane %v319_v14, %v176_v53  ;;  %v365_v20 = vcombine.low %v256_v13, %v247_v12  ;;  %1225 = vmatpush3.bf16.msra.mxu0 %v1349_v8  ;;  %1153 = vmatprep.mubr.msk.f32.mxu0 %vm1283_vm7, %v1282_v55 }
 0x124   :  { %v272_v21 = vcombine.low %v217_v15, %v240_v0  ;;  %v318_v22 = vrot.slane %v311_v18, %v176_v53  ;;  %v357_v23 = vrot.slane %v350_v17, %v176_v53  ;;  %v271_v24 = vrot.slane %v264_v16, %v176_v53  ;;  %1226 = vmatprep.subr.bf16.mxu0 %v1280_v5 }
 0x125   :  { %v333_v25 = vrot.slane %v326_v19, %v176_v53  ;;  %v372_v26 = vrot.slane %v365_v20, %v176_v53 }
 0x126   :  { %v336_v29 = vsel %vm289_vm6, %v318_v22, -inf  ;;  %v364_v30 = vrot.slane %v357_v23, %v176_v53  ;;  %v279_v31 = vrot.slane %v272_v21, %v176_v53  ;;  %v290_v32 = vsel %vm289_vm6, %v271_v24, -inf }
 0x127   :  { %v337_v33 = vrot.slane %v336_v29, 4  ;;  %v343_v34 = vsel %vm289_vm6, %v333_v25, -inf  ;;  %v379_v35 = vrot.slane %v372_v26, %v176_v53  ;;  %v291_v36 = vrot.slane %v290_v32, 4  ;;  %1228 = vmatpush3.bf16.msra.mxu0 %v1215_v59 }
 0x128   :  { %v344_v37 = vrot.slane %v343_v34, 4  ;;  %v382_v38 = vsel %vm289_vm6, %v364_v30, -inf  ;;  %v286_v39 = vrot.slane %v279_v31, %v176_v53  ;;  %1247 = vmatprep.subr.bf16.mxu0 %v1280_v5 }
 0x129   :  { %v338_v41 = vmax.f32 %v336_v29, %v337_v33  ;;  %v383_v42 = vrot.slane %v382_v38, 4  ;;  %v389_v43 = vsel %vm289_vm6, %v379_v35, -inf  ;;  %v292_v44 = vmax.f32 %v290_v32, %v291_v36  ;;  %v1054_v29 = vld [vmem:[%s1557_s6 + $0x3] ss:$0 sm:$0xff] }
 0x12a   :  { %v345_v48 = vmax.f32 %v343_v34, %v344_v37  ;;  %v390_v49 = vrot.slane %v389_v43, 4  ;;  %v297_v50 = vsel %vm289_vm6, %v286_v39, -inf }
 0x12b   :  { %v339_v51 = vrot.slane %v338_v41, 2  ;;  %v384_v52 = vmax.f32 %v382_v38, %v383_v42  ;;  %v293_v53 = vrot.slane %v292_v44, 2  ;;  %v298_v54 = vrot.slane %v297_v50, 4 }
 0x12c   :  { %v346_v57 = vrot.slane %v345_v48, 2  ;;  %v391_v58 = vmax.f32 %v389_v43, %v390_v49 }
 0x12d   :  { %v340_v60 = vmax.f32 %v338_v41, %v339_v51  ;;  %v385_v61 = vrot.slane %v384_v52, 2  ;;  %v294_v62 = vmax.f32 %v292_v44, %v293_v53  ;;  %v299_v63 = vmax.f32 %v297_v50, %v298_v54 }
 0x12e   :  { %v347_v0 = vmax.f32 %v345_v48, %v346_v57  ;;  %v392_v1 = vrot.slane %v391_v58, 2 }
 0x12f   :  { %v341_v2 = vrot.slane %v340_v60, 1  ;;  %v386_v3 = vmax.f32 %v384_v52, %v385_v61  ;;  %v300_v4 = vrot.slane %v299_v63, 2  ;;  %v295_v11 = vrot.slane %v294_v62, 1 }
 0x130   :  { %v348_v6 = vrot.slane %v347_v0, 1  ;;  %v393_v7 = vmax.f32 %v391_v58, %v392_v1 }
 0x131   :  { %v342_v9 = vmax.f32 %v340_v60, %v341_v2  ;;  %v387_v10 = vrot.slane %v386_v3, 1  ;;  %v301_v12 = vmax.f32 %v299_v63, %v300_v4  ;;  %v296_v19 = vmax.f32 %v294_v62, %v295_v11 }
 0x132   :  { %v349_v13 = vmax.f32 %v347_v0, %v348_v6  ;;  %v394_v14 = vrot.slane %v393_v7, 1 }
 0x133   :  { %v388_v15 = vmax.f32 %v386_v3, %v387_v10  ;;  %v302_v16 = vrot.slane %v301_v12, 1 }
 0x134   :  { %v403_v17 = vsel %vm398_vm8, %v349_v13, %v342_v9  ;;  %v395_v18 = vmax.f32 %v393_v7, %v394_v14  ;;  %v1441_v7 = vsub.s32 0, %v1360_v45 }
 0x135   :  { %404 = vrot.lane.b32.xlu0 %v403_v17, %s1284_s2  ;;  %v303_v20 = vmax.f32 %v301_v12, %v302_v16 }
 0x136   :  { %v409_v21 = vsel %vm398_vm8, %v395_v18, %v388_v15 }
 0x137   :  { %v399_v22 = vsel %vm398_vm8, %v303_v20, %v296_v19 }
 0x139   :  { %410 = vrot.lane.b32.xlu0 %v409_v21, %s1285_s3 }
 0x1a7   :  { %v405_v23 = vpop.permute.xlu0 %404 }
 0x1a8   :  { %v413_v24 = vsel %vm123_vm5, %v399_v22, %v405_v23 }
 0x1ab   :  { %v411_v25 = vpop.permute.xlu0 %410 }
 0x1ac   :  { %v415_v26 = vsel %vm414_vm9, %v413_v24, %v411_v25 }
 0x1ad   :  { %1121 = vmatmul.mubr.msk.f32.vlgmr.msra.gmra.mrb[0].mxu1 %vm424_vm10, %v415_v26 }
 0x1ae   :  { %1219 = vmatpush3.bf16.msra.mxu1 %v1349_v8  ;;  %1142 = vmatprep.mubr.msk.f32.mxu1 %vm1283_vm7, %v1282_v55 }
 0x1af   :  { %1220 = vmatprep.subr.bf16.mxu1 %v1280_v5 }
 0x1b2   :  { %1222 = vmatpush3.bf16.msra.mxu1 %v1215_v59 }
 0x1b3   :  { %1229 = vmatprep.subr.bf16.mxu1 %v1280_v5 }
 0x1f5   :  { %v572_v27 = vpop.f32.mrb[2].mxu0 }
 0x1f6   :  { %v1133_v28 = vpop.f32.mrb[3].mxu0 }
 0x280   :  { %v494_v30 = vpop.f32.mrb[0].mxu1 }
 0x281   :  { %v495_v31 = vadd.f32 %v1054_v29, %v494_v30  ;;  %v1122_v32 = vpop.f32.mrb[1].mxu1 }
 0x282   :  { %v861_v32 = vld [vmem:[%s1559_s4 + $0x8] sm:$0xff] }
 0x283   :  { %v576_v33 = vadd.f32 %v572_v27, %v495_v31 }
 0x285   :  { %1271 = vtanh.f32 %v576_v33  ;;  %v862_v33 = vld [vmem:[%s1559_s4 + $0x10] sm:$0xff] }
 0x28f   :  { %v1415_v8 = vpop.eup %1271 }
 0x290   :  { %1143 = vmatmul.mubr.msk.f32.vlgmr.msra.gmra.mrb[2].mxu1 %vm502_vm11, %v1415_v8  ;;  %v739_v60 = vsel %vm738_vm14, %v1415_v8, 0.0 }
 0x291   :  { %1180 = vmatprep.mubr.msk.f32.mxu1 %vm1283_vm7, %v1282_v55  ;;  %v740_v61 = vrot.slane %v739_v60, 4 }
 0x293   :  { %v741_v62 = vadd.f32 %v740_v61, %v739_v60  ;;  %v868_v61 = vld [vmem:[%s1559_s4 + $0x40] sm:$0xff] }
 0x295   :  { %v742_v63 = vrot.slane %v741_v62, 2 }
 0x297   :  { %v743_v0 = vadd.f32 %v742_v63, %v741_v62  ;;  %v869_v62 = vld [vmem:[%s1559_s4 + $0x48] sm:$0xff] }
 0x298   :  { %v1242_v63 = vpack.c.bf16 %v869_v62, %v868_v61 }
 0x299   :  { %v744_v1 = vrot.slane %v743_v0, 1 }
 0x29b   :  { %v745_v3 = vadd.f32 %v744_v1, %v743_v0  ;;  %v870_v0 = vld [vmem:[%s1559_s4 + $0x50] sm:$0xff]  ;;  %v871_v1 = vld [vmem:[%s1559_s4 + $0x58] sm:$0xff] }
 0x363   :  { %v647_v34 = vpop.f32.mrb[2].mxu1 }
 0x364   :  { %652 = vrot.lane.b32.xlu1 %v647_v34, %s1286_s29  ;;  %v1144_v35 = vpop.f32.mrb[3].mxu1 }
 0x365   :  { %v863_v35 = vld [vmem:[%s1559_s4 + $0x18] sm:$0xff] }
 0x3d6   :  { %v653_v36 = vpop.permute.xlu1 %652 }
 0x3d7   :  { %v655_v37 = vadd.f32 %v653_v36, %v495_v31  ;;  %v1233_v36 = vpack.c.bf16 %v863_v35, %v862_v33 }
 0x3d9   :  { %1273 = vtanh.f32 %v655_v37  ;;  %v864_v37 = vld [vmem:[%s1559_s4 + $0x20] sm:$0xff] }
 0x3e3   :  { %v1422_v38 = vpop.eup %1273 }
 0x3e4   :  { %658 = vrot.lane.b32.xlu1 %v1422_v38, %s1287_s30  ;;  %v747_v39 = vsel %vm746_vm12, %v1422_v38, 0.0 }
 0x3e5   :  { %v748_v40 = vrot.slane %v747_v39, 4 }
 0x3e7   :  { %v749_v41 = vadd.f32 %v748_v40, %v747_v39  ;;  %v865_v39 = vld [vmem:[%s1559_s4 + $0x28] sm:$0xff] }
 0x3e8   :  { %v1236_v40 = vpack.c.bf16 %v865_v39, %v864_v37  ;;  %v1060_v39 = vld [vmem:[%s1557_s6 + $0x7] ss:$0 sm:$0xff] }
 0x3e9   :  { %v750_v42 = vrot.slane %v749_v41, 2 }
 0x3eb   :  { %v751_v43 = vadd.f32 %v750_v42, %v749_v41  ;;  %v866_v41 = vld [vmem:[%s1559_s4 + $0x30] sm:$0xff]  ;;  %v867_v42 = vld [vmem:[%s1559_s4 + $0x38] sm:$0xff] }
 0x3ed   :  { %v752_v44 = vrot.slane %v751_v43, 1 }
 0x3ef   :  { %v753_v46 = vadd.f32 %v752_v44, %v751_v43  ;;  %v1239_v43 = vpack.c.bf16 %v867_v42, %v866_v41 }
 0x3f1   :  { %755 = vrot.lane.b32.xlu1 %v753_v46, %s1287_s30 }
 0x456   :  { %v659_v47 = vpop.permute.xlu1 %658 }
 0x457   :  { %1154 = vmatmul.mubr.msk.f32.vlgmr.msra.gmra.mrb[4].mxu0 %vm502_vm11, %v659_v47 }
 0x458   :  { %1199 = vmatprep.mubr.msk.f32.mxu0 %vm1283_vm7, %v1282_v55 }
 0x463   :  { %v756_v2 = vpop.permute.xlu1 %755 }
 0x464   :  { %v758_v4 = vadd.f32 %v756_v2, %v745_v3  ;;  %v1245_v2 = vpack.c.bf16 %v871_v1, %v870_v0  ;;  %v824_v3 = vld [vmem:[%s1557_s6 + $0x4] sm:$0x1] }
 0x52a   :  { %v728_v48 = vpop.f32.mrb[4].mxu0 }
 0x52b   :  { %733 = vrot.lane.b32.xlu0 %v728_v48, %s1288_s8  ;;  %v1155_v49 = vpop.f32.mrb[5].mxu0 }
 0x59d   :  { %v734_v50 = vpop.permute.xlu0 %733 }
 0x59e   :  { %v736_v51 = vadd.f32 %v734_v50, %v495_v31  ;;  %v860_v31 = vld [vmem:[%s1559_s4] sm:$0xff] }
 0x59f   :  { %v1230_v34 = vpack.c.bf16 %v861_v32, %v860_v31 }
 0x5a0   :  { %1275 = vtanh.f32 %v736_v51 }
 0x5a1   :  { %1231 = vmatpush3.bf16.msra.mxu1 %v1230_v34 }
 0x5a2   :  { %1232 = vmatprep.subr.bf16.mxu1 %v1280_v5 }
 0x5a5   :  { %1234 = vmatpush3.bf16.msra.mxu1 %v1233_v36 }
 0x5a6   :  { %1235 = vmatprep.subr.bf16.mxu1 %v1280_v5 }
 0x5a9   :  { %1237 = vmatpush3.bf16.msra.mxu1 %v1236_v40 }
 0x5aa   :  { %v1433_v52 = vpop.eup %1275  ;;  %1238 = vmatprep.subr.bf16.mxu1 %v1280_v5 }
 0x5ab   :  { %v760_v53 = vsel %vm759_vm13, %v1433_v52, 0.0 }
 0x5ac   :  { %v761_v54 = vrot.slane %v760_v53, 4 }
 0x5ad   :  { %1240 = vmatpush3.bf16.msra.mxu1 %v1239_v43 }
 0x5ae   :  { %v762_v56 = vadd.f32 %v761_v54, %v760_v53  ;;  %1241 = vmatprep.subr.bf16.mxu1 %v1280_v5 }
 0x5b0   :  { %v763_v57 = vrot.slane %v762_v56, 2 }
 0x5b1   :  { %1243 = vmatpush3.bf16.msra.mxu1 %v1242_v63 }
 0x5b2   :  { %v764_v58 = vadd.f32 %v763_v57, %v762_v56  ;;  %1244 = vmatprep.subr.bf16.mxu1 %v1280_v5 }
 0x5b4   :  { %v765_v59 = vrot.slane %v764_v58, 1 }
 0x5b5   :  { %1246 = vmatpush3.bf16.msra.mxu1 %v1245_v2 }
 0x5b6   :  { %v766_v55 = vadd.f32 %v765_v59, %v764_v58 }
 0x5b8   :  { %768 = vrot.lane.b32.xlu0 %v766_v55, %s1288_s8 }
 0x62a   :  { %v769_v6 = vpop.permute.xlu0 %768 }
 0x62b   :  { %v771_v9 = vadd.f32 %v769_v6, %v758_v4 }
 0x62d   :  { %v1443_v10 = vmul.f32 0.16666667, %v771_v9  ;;  %v956_v9 = vld [vmem:[%s1560_s5] sm:$0xff] }
 0x62f   :  { %v776_v11 = vrot.slane %v1443_v10, %v1441_v7 }
 0x631   :  { %804 = vrot.lane.b32.xlu0 %v776_v11, %s1288_s8  ;;  %787 = vrot.lane.b32.xlu1 %v776_v11, %s1286_s29  ;;  %v777_v44 = vsub.f32 %v1415_v8, %v776_v11  ;;  %v957_v11 = vld [vmem:[%s1560_s5 + $0x8] sm:$0xff] }
 0x633   :  { %v778_v46 = vmul.f32 %v777_v44, %v777_v44 }
 0x635   :  { %v779_v47 = vsel %vm738_vm14, %v778_v46, 0.0 }
 0x636   :  { %v780_v48 = vrot.slane %v779_v47, 4 }
 0x638   :  { %v781_v49 = vadd.f32 %v780_v48, %v779_v47 }
 0x63a   :  { %v782_v50 = vrot.slane %v781_v49, 2 }
 0x63c   :  { %v783_v51 = vadd.f32 %v782_v50, %v781_v49 }
 0x63e   :  { %v784_v53 = vrot.slane %v783_v51, 1 }
 0x640   :  { %v785_v54 = vadd.f32 %v784_v53, %v783_v51 }
 0x6a3   :  { %v805_v12 = vpop.permute.xlu0 %804  ;;  %v788_v13 = vpop.permute.xlu1 %787 }
 0x6a4   :  { %v807_v14 = vsub.f32 %v1433_v52, %v805_v12  ;;  %v790_v15 = vsub.f32 %v1422_v38, %v788_v13  ;;  %v958_v12 = vld [vmem:[%s1560_s5 + $0x10] sm:$0xff]  ;;  %v826_v13 = vld [vmem:[%s1557_s6 + $0x5] sm:$0x1] }
 0x6a6   :  { %v808_v16 = vmul.f32 %v807_v14, %v807_v14  ;;  %v791_v17 = vmul.f32 %v790_v15, %v790_v15  ;;  %v1248_v14 = vpack.c.bf16 %v957_v11, %v956_v9  ;;  %v959_v15 = vld [vmem:[%s1560_s5 + $0x18] sm:$0xff] }
 0x6a8   :  { %v809_v45 = vsel %vm759_vm13, %v808_v16, 0.0  ;;  %v792_v18 = vsel %vm746_vm12, %v791_v17, 0.0  ;;  %1249 = vmatpush3.bf16.msra.mxu0 %v1248_v14 }
 0x6a9   :  { %v810_v19 = vrot.slane %v809_v45, 4  ;;  %v793_v20 = vrot.slane %v792_v18, 4  ;;  %1250 = vmatprep.subr.bf16.mxu0 %v1280_v5 }
 0x6ab   :  { %v811_v21 = vadd.f32 %v810_v19, %v809_v45  ;;  %v794_v22 = vadd.f32 %v793_v20, %v792_v18  ;;  %v1251_v45 = vpack.c.bf16 %v959_v15, %v958_v12  ;;  %v960_v19 = vld [vmem:[%s1560_s5 + $0x20] sm:$0xff]  ;;  %v961_v20 = vld [vmem:[%s1560_s5 + $0x28] sm:$0xff] }
 0x6ad   :  { %v812_v23 = vrot.slane %v811_v21, 2  ;;  %v795_v24 = vrot.slane %v794_v22, 2  ;;  %1252 = vmatpush3.bf16.msra.mxu0 %v1251_v45 }
 0x6ae   :  { %1253 = vmatprep.subr.bf16.mxu0 %v1280_v5 }
 0x6af   :  { %v813_v25 = vadd.f32 %v812_v23, %v811_v21  ;;  %v796_v26 = vadd.f32 %v795_v24, %v794_v22  ;;  %v1254_v22 = vpack.c.bf16 %v961_v20, %v960_v19 }
 0x6b1   :  { %v814_v27 = vrot.slane %v813_v25, 1  ;;  %v797_v28 = vrot.slane %v796_v26, 1  ;;  %1255 = vmatpush3.bf16.msra.mxu0 %v1254_v22 }
 0x6b2   :  { %1256 = vmatprep.subr.bf16.mxu0 %v1280_v5  ;;  %v962_v5 = vld [vmem:[%s1560_s5 + $0x30] sm:$0xff] }
 0x6b3   :  { %v815_v29 = vadd.f32 %v814_v27, %v813_v25  ;;  %v798_v30 = vadd.f32 %v797_v28, %v796_v26 }
 0x6b5   :  { %817 = vrot.lane.b32.xlu0 %v815_v29, %s1288_s8  ;;  %800 = vrot.lane.b32.xlu1 %v798_v30, %s1287_s30 }
 0x727   :  { %v801_v56 = vpop.permute.xlu1 %800  ;;  %v818_v58 = vpop.permute.xlu0 %817 }
 0x728   :  { %v803_v57 = vadd.f32 %v801_v56, %v785_v54 }
 0x72a   :  { %v820_v59 = vadd.f32 %v818_v58, %v803_v57 }
 0x72c   :  { %v821_v55 = vmul.f32 0.16666667, %v820_v59 }
 0x72e   :  { %v822_v60 = vadd.f32 1e-05, %v821_v55 }
 0x730   :  { %1277 = vrsqrt.f32 %v822_v60 }
 0x73a   :  { %v1278_v4 = vpop.eup %1277 }
 0x73b   :  { %v825_v6 = vmul.f32 %v1278_v4, %v824_v3 }
 0x73d   :  { %v832_v16 = vrot.slane %v825_v6, %v1441_v7  ;;  %v827_v17 = vmul.f32 %v825_v6, %v1443_v10 }
 0x73f   :  { %849 = vrot.lane.b32.xlu0 %v832_v16, %s1288_s8  ;;  %840 = vrot.lane.b32.xlu1 %v832_v16, %s1286_s29  ;;  %v828_v18 = vsub.f32 %v826_v13, %v827_v17  ;;  %v833_v21 = vmul.f32 %v1415_v8, %v832_v16 }
 0x741   :  { %v837_v10 = vrot.slane %v828_v18, %v1441_v7 }
 0x743   :  { %853 = vrot.lane.b32.xlu0 %v837_v10, %s1288_s8  ;;  %v838_v23 = vadd.f32 %v837_v10, %v833_v21  ;;  %845 = vrot.lane.b32.xlu1 %v837_v10, %s1286_s29 }
 0x747   :  { %952 = vrot.lane.b32.xlu1 %v1433_v52, %s1287_s30 }
 0x7b1   :  { %v850_v24 = vpop.permute.xlu0 %849  ;;  %v841_v25 = vpop.permute.xlu1 %840 }
 0x7b2   :  { %v852_v8 = vmul.f32 %v1433_v52, %v850_v24  ;;  %v843_v7 = vmul.f32 %v1422_v38, %v841_v25  ;;  %v963_v52 = vld [vmem:[%s1560_s5 + $0x38] sm:$0xff]  ;;  %v1058_v38 = vld [vmem:[%s1557_s6 + $0x6] ss:$0 sm:$0xff] }
 0x7b3   :  { %v1257_v32 = vpack.c.bf16 %v963_v52, %v962_v5 }
 0x7b5   :  { %v854_v26 = vpop.permute.xlu0 %853  ;;  %v846_v27 = vpop.permute.xlu1 %845  ;;  %1258 = vmatpush3.bf16.msra.mxu0 %v1257_v32 }
 0x7b6   :  { %v856_v28 = vadd.f32 %v854_v26, %v852_v8  ;;  %v848_v29 = vadd.f32 %v846_v27, %v843_v7 }
 0x7b8   :  { %v857_v30 = vsel %vm502_vm11, %v838_v23, %v848_v29 }
 0x7b9   :  { %v859_v31 = vsel %vm858_vm15, %v857_v30, %v856_v28  ;;  %v953_v36 = vpop.permute.xlu1 %952 }
 0x7ba   :  { %1181 = vmatmul.mubr.msk.f32.vlgmr.msra.gmra.mrb[4].mxu1 %vm877_vm0, %v859_v31 }
 0x88d   :  { %v947_v33 = vpop.f32.mrb[4].mxu1 }
 0x88e   :  { %v948_v34 = vadd.f32 %v1058_v38, %v947_v33  ;;  %v1182_v35 = vpop.f32.mrb[5].mxu1 }
 0x890   :  { %v955_v37 = vsel %vm502_vm11, %v948_v34, %v953_v36 }
 0x891   :  { %1200 = vmatmul.mubr.msk.f32.vlgmr.msra.gmra.mrb[6].mxu0 %vm858_vm15, %v955_v37 }
 0x964   :  { %v1038_v40 = vpop.f32.mrb[6].mxu0 }
 0x965   :  { %v1039_v41 = vadd.f32 %v1060_v39, %v1038_v40  ;;  %v1201_v42 = vpop.f32.mrb[7].mxu0 }
 0x967   :  { %1042 = vst [vmem:[%s1561_s7] sm:$0x3] %v1039_v41 }

</bundles_post_ra>
